<compile_context>
chip_gen: v7x
topology: tpu7x:2x2x1
jax: 0.10.0
libtpu: 0.0.40
codegen_flags: <defaults>
</compile_context>

<pallas_src>
import functools

import jax
import jax.numpy as jnp
from jax.experimental import pallas as pl
from jax.experimental.pallas import tpu as pltpu


_LANE = 128
_SUBLANE = 8
# Per-step (single-buffered) in+out HBM traffic target.  Double-buffered this
# is ~24 MiB of VMEM, under the explicit 32 MiB scoped-VMEM limit below.
_STEP_BYTES = 12 * 1024 * 1024
_VMEM_LIMIT = 32 * 1024 * 1024


def _chunk_rows(c_out):
    """Rows (of 128 lanes) per in-kernel compute chunk.

    Keeps (C_out accumulators + one input-channel chunk) within ~48 vregs of
    the 64-vreg file so the FMA chain never spills to VMEM.
    """
    budget_elems = 48 * _SUBLANE * _LANE          # ~48 f32 vregs
    rows = budget_elems // ((c_out + 1) * _LANE)
    rows = max(_SUBLANE, (min(rows, 512) // _SUBLANE) * _SUBLANE)
    return rows


def _largest_divisor_leq(n, cap):
    cap = max(1, min(n, cap))
    for d in range(cap, 0, -1):
        if n % d == 0:
            return d
    return 1


def _conv1x1_kernel(chunk, w_ref, b_ref, x_ref, o_ref):
    """Per-tile body.

    w_ref : (C_out, C_in)             SMEM f32 scalar table
    b_ref : (C_out,)                  SMEM f32 scalar table
    x_ref : (BN, C_in,  R[, 128])     VMEM
    o_ref : (BN, C_out, R[, 128])     VMEM
    chunk : static number of axis-2 units per compute chunk.
    """
    bn, c_in = x_ref.shape[0], x_ref.shape[1]
    c_out = o_ref.shape[1]
    r_total = x_ref.shape[2]
    tail = (slice(None),) * (len(x_ref.shape) - 3)

    # Hoist the tiny scalar tables out of the chunk loops (SMEM reads).
    w = [[w_ref[co, ci] for ci in range(c_in)] for co in range(c_out)]
    b = [b_ref[co] for co in range(c_out)]

    # Static strip-mining over (batch-block, rows): per-chunk values stay in
    # vregs, so VMEM traffic is just the pipelined block loads / stores.
    if r_total >= chunk:
        r_step, b_step = chunk, 1
    else:
        r_step, b_step = r_total, max(1, chunk // r_total)

    for b0 in range(0, bn, b_step):
        nb = min(b_step, bn - b0)
        bsl = slice(b0, b0 + nb)
        for r0 in range(0, r_total, r_step):
            nr = min(r_step, r_total - r0)
            rsl = slice(r0, r0 + nr)

            accs = [None] * c_out
            for ci in range(c_in):
                # One load per input channel chunk, shared by all outputs.
                xc = x_ref[(bsl, ci, rsl) + tail].astype(jnp.float32)
                for co in range(c_out):
                    if accs[co] is None:
                        # Bias folded into the accumulator init (no splat).
                        accs[co] = xc * w[co][ci] + b[co]
                    else:
                        accs[co] = accs[co] + xc * w[co][ci]
            for co in range(c_out):
                # Direct per-channel dense store (no concatenate).
                o_ref[(bsl, co, rsl) + tail] = accs[co].astype(o_ref.dtype)


def ch_decrease_forward(x_nchw, weight, bias):
    """Equivalent of nn.Conv2d(inplanes, inplanes // times, kernel_size=1)(x).

    x_nchw : (N, C_in, H, W)
    weight : (C_out, C_in, 1, 1)   (PyTorch conv weight layout)
    bias   : (C_out,)
    returns: (N, C_out, H, W)
    """
    N, C_in, H, W = x_nchw.shape
    C_out = weight.shape[0]
    S = H * W
    itemsize = jnp.dtype(x_nchw.dtype).itemsize

    w_mat = weight.reshape(C_out, C_in).astype(jnp.float32)
    b_vec = bias.reshape(C_out).astype(jnp.float32)

    # Rows (of 128 lanes) per grid step that meet the HBM/VMEM budget.
    row_bytes = (C_in + C_out) * _LANE * itemsize
    r_target = max(_SUBLANE, (_STEP_BYTES // row_bytes // _SUBLANE) * _SUBLANE)
    chunk_rows = _chunk_rows(C_out)

    cost = pl.CostEstimate(
        flops=2 * N * S * C_in * C_out,
        transcendentals=0,
        bytes_accessed=N * S * (C_in + C_out) * itemsize
        + (C_in + 1) * C_out * 4,
    )
    cparams = pltpu.CompilerParams(
        dimension_semantics=("parallel", "parallel"),
        vmem_limit_bytes=_VMEM_LIMIT,
    )
    smem_spec = pl.BlockSpec(memory_space=pltpu.MemorySpace.SMEM)

    if S % _LANE == 0:
        # Primary path: sublane+lane dense (N, C, S//128, 128) free view.
        RS = S // _LANE
        x_in = x_nchw.reshape(N, C_in, RS, _LANE)
        if RS > r_target:
            BN, R = 1, r_target                     # tile rows within an image
        else:
            R = RS                                  # whole image per step
            want_bn = max(1, r_target // max(RS, 1))
            if N >= 2:                              # keep >=2 steps (2-TC chips)
                want_bn = min(want_bn, -(-N // 2))
            BN = _largest_divisor_leq(N, want_bn)
        grid = (N // BN, pl.cdiv(RS, R))
        in_specs = [
            smem_spec, smem_spec,
            pl.BlockSpec((BN, C_in, R, _LANE), lambda n, r: (n, 0, r, 0)),
        ]
        out_spec = pl.BlockSpec((BN, C_out, R, _LANE), lambda n, r: (n, 0, r, 0))
        out_shape = jax.ShapeDtypeStruct((N, C_out, RS, _LANE), x_nchw.dtype)
        kern = functools.partial(_conv1x1_kernel, chunk_rows)
    else:
        # Fallback for awkward S: lane-dense 3D layout with a *capped* spatial
        # tile (never an unbounded TS==S block for huge S).
        x_in = x_nchw.reshape(N, C_in, S)
        ts_target = r_target * _LANE
        if S > ts_target:
            BN, TS = 1, ts_target
        else:
            TS = S
            want_bn = max(1, ts_target // max(S, 1))
            if N >= 2:
                want_bn = min(want_bn, -(-N // 2))
            BN = _largest_divisor_leq(N, want_bn)
        grid = (N // BN, pl.cdiv(S, TS))
        in_specs = [
            smem_spec, smem_spec,
            pl.BlockSpec((BN, C_in, TS), lambda n, s: (n, 0, s)),
        ]
        out_spec = pl.BlockSpec((BN, C_out, TS), lambda n, s: (n, 0, s))
        out_shape = jax.ShapeDtypeStruct((N, C_out, S), x_nchw.dtype)
        kern = functools.partial(_conv1x1_kernel, chunk_rows * _LANE)

    out = pl.pallas_call(
        kern,
        out_shape=out_shape,
        grid_spec=pltpu.PrefetchScalarGridSpec(
            num_scalar_prefetch=0,
            grid=grid,
            in_specs=in_specs,
            out_specs=out_spec,
        ),
        compiler_params=cparams,
        cost_estimate=cost,
    )(w_mat, b_vec, x_in)

    return out.reshape(N, C_out, H, W)


def _check(key, N, inplanes, times, H, W):
    C_out = inplanes // times
    kx, kw, kb = jax.random.split(key, 3)
    x = jax.random.normal(kx, (N, inplanes, H, W), dtype=jnp.float32)
    bound = 1.0 / jnp.sqrt(jnp.float32(inplanes))
    weight = jax.random.uniform(kw, (C_out, inplanes, 1, 1),
                                minval=-bound, maxval=bound, dtype=jnp.float32)
    bias = jax.random.uniform(kb, (C_out,),
                              minval=-bound, maxval=bound, dtype=jnp.float32)

    out = jax.block_until_ready(ch_decrease_forward(x, weight, bias))

    ref = jnp.einsum("nchw,oc->nohw", x, weight.reshape(C_out, inplanes)) \
          + bias.reshape(1, C_out, 1, 1)
    assert out.shape == (N, C_out, H, W)
    assert jnp.allclose(out, ref, atol=1e-5, rtol=1e-5)


if __name__ == "__main__":
    key = jax.random.PRNGKey(0)
    k1, k2, k3 = jax.random.split(key, 3)

    # Module config: inplanes=4, times=2  =>  C_in=4, C_out=2 (small test shape).
    _check(k1, N=2, inplanes=4, times=2, H=16, W=16)
    # Larger image: exercises row tiling + ragged last row-block.
    _check(k2, N=1, inplanes=4, times=2, H=1024, W=640)
    # S not divisible by 128: exercises the lane-dense fallback path.
    _check(k3, N=3, inplanes=4, times=2, H=10, W=10)

    print("KERNEL_OK")
</pallas_src>

<mosaic_0001>
module attributes {stable_mosaic.version = 11 : i64} {
  func.func @_conv1x1_kernel(%arg0: i32, %arg1: i32, %arg2: memref<2x4xf32, #tpu.memory_space<smem>>, %arg3: memref<2xf32, #tpu.memory_space<smem>>, %arg4: memref<1x4x2x128xf32, #tpu.memory_space<vmem>>, %arg5: memref<1x2x2x128xf32, #tpu.memory_space<vmem>>) attributes {dimension_semantics = [#tpu.dimension_semantics<parallel>, #tpu.dimension_semantics<parallel>], iteration_bounds = array<i64: 2, 1>, scalar_prefetch = 0 : i64, scratch_operands = 0 : i64, tpu.core_type = #tpu.core_type<tc>, window_params = [{transform_indices = @transform_0, window_bounds = array<i64: 2, 4>}, {transform_indices = @transform_1, window_bounds = array<i64: 2>}, {transform_indices = @transform_2, window_bounds = array<i64: 1, 4, 2, 128>}, {transform_indices = @transform_3, window_bounds = array<i64: 1, 2, 2, 128>}]} {
    %c0 = arith.constant 0 : index
    %c0_0 = arith.constant 0 : index
    %0 = memref.load %arg2[%c0, %c0_0] : memref<2x4xf32, #tpu.memory_space<smem>>
    %c0_1 = arith.constant 0 : index
    %c1 = arith.constant 1 : index
    %1 = memref.load %arg2[%c0_1, %c1] : memref<2x4xf32, #tpu.memory_space<smem>>
    %c0_2 = arith.constant 0 : index
    %c2 = arith.constant 2 : index
    %2 = memref.load %arg2[%c0_2, %c2] : memref<2x4xf32, #tpu.memory_space<smem>>
    %c0_3 = arith.constant 0 : index
    %c3 = arith.constant 3 : index
    %3 = memref.load %arg2[%c0_3, %c3] : memref<2x4xf32, #tpu.memory_space<smem>>
    %c1_4 = arith.constant 1 : index
    %c0_5 = arith.constant 0 : index
    %4 = memref.load %arg2[%c1_4, %c0_5] : memref<2x4xf32, #tpu.memory_space<smem>>
    %c1_6 = arith.constant 1 : index
    %c1_7 = arith.constant 1 : index
    %5 = memref.load %arg2[%c1_6, %c1_7] : memref<2x4xf32, #tpu.memory_space<smem>>
    %c1_8 = arith.constant 1 : index
    %c2_9 = arith.constant 2 : index
    %6 = memref.load %arg2[%c1_8, %c2_9] : memref<2x4xf32, #tpu.memory_space<smem>>
    %c1_10 = arith.constant 1 : index
    %c3_11 = arith.constant 3 : index
    %7 = memref.load %arg2[%c1_10, %c3_11] : memref<2x4xf32, #tpu.memory_space<smem>>
    %c0_12 = arith.constant 0 : index
    %8 = memref.load %arg3[%c0_12] : memref<2xf32, #tpu.memory_space<smem>>
    %c1_13 = arith.constant 1 : index
    %9 = memref.load %arg3[%c1_13] : memref<2xf32, #tpu.memory_space<smem>>
    %c0_14 = arith.constant 0 : index
    %c0_15 = arith.constant 0 : index
    %c0_16 = arith.constant 0 : index
    %c0_17 = arith.constant 0 : index
    %10 = vector.load %arg4[%c0_14, %c0_15, %c0_16, %c0_17] : memref<1x4x2x128xf32, #tpu.memory_space<vmem>>, vector<1x1x2x128xf32>
    %11 = vector.shape_cast %10 : vector<1x1x2x128xf32> to vector<1x2x128xf32>
    %12 = vector.broadcast %0 : f32 to vector<1x2x128xf32>
    %13 = arith.mulf %11, %12 : vector<1x2x128xf32>
    %14 = vector.broadcast %8 : f32 to vector<1x2x128xf32>
    %15 = arith.addf %13, %14 : vector<1x2x128xf32>
    %16 = vector.broadcast %4 : f32 to vector<1x2x128xf32>
    %17 = arith.mulf %11, %16 : vector<1x2x128xf32>
    %18 = vector.broadcast %9 : f32 to vector<1x2x128xf32>
    %19 = arith.addf %17, %18 : vector<1x2x128xf32>
    %c0_18 = arith.constant 0 : index
    %c1_19 = arith.constant 1 : index
    %c0_20 = arith.constant 0 : index
    %c0_21 = arith.constant 0 : index
    %20 = vector.load %arg4[%c0_18, %c1_19, %c0_20, %c0_21] : memref<1x4x2x128xf32, #tpu.memory_space<vmem>>, vector<1x1x2x128xf32>
    %21 = vector.shape_cast %20 : vector<1x1x2x128xf32> to vector<1x2x128xf32>
    %22 = vector.broadcast %1 : f32 to vector<1x2x128xf32>
    %23 = arith.mulf %21, %22 : vector<1x2x128xf32>
    %24 = arith.addf %15, %23 : vector<1x2x128xf32>
    %25 = vector.broadcast %5 : f32 to vector<1x2x128xf32>
    %26 = arith.mulf %21, %25 : vector<1x2x128xf32>
    %27 = arith.addf %19, %26 : vector<1x2x128xf32>
    %c0_22 = arith.constant 0 : index
    %c2_23 = arith.constant 2 : index
    %c0_24 = arith.constant 0 : index
    %c0_25 = arith.constant 0 : index
    %28 = vector.load %arg4[%c0_22, %c2_23, %c0_24, %c0_25] : memref<1x4x2x128xf32, #tpu.memory_space<vmem>>, vector<1x1x2x128xf32>
    %29 = vector.shape_cast %28 : vector<1x1x2x128xf32> to vector<1x2x128xf32>
    %30 = vector.broadcast %2 : f32 to vector<1x2x128xf32>
    %31 = arith.mulf %29, %30 : vector<1x2x128xf32>
    %32 = arith.addf %24, %31 : vector<1x2x128xf32>
    %33 = vector.broadcast %6 : f32 to vector<1x2x128xf32>
    %34 = arith.mulf %29, %33 : vector<1x2x128xf32>
    %35 = arith.addf %27, %34 : vector<1x2x128xf32>
    %c0_26 = arith.constant 0 : index
    %c3_27 = arith.constant 3 : index
    %c0_28 = arith.constant 0 : index
    %c0_29 = arith.constant 0 : index
    %36 = vector.load %arg4[%c0_26, %c3_27, %c0_28, %c0_29] : memref<1x4x2x128xf32, #tpu.memory_space<vmem>>, vector<1x1x2x128xf32>
    %37 = vector.shape_cast %36 : vector<1x1x2x128xf32> to vector<1x2x128xf32>
    %38 = vector.broadcast %3 : f32 to vector<1x2x128xf32>
    %39 = arith.mulf %37, %38 : vector<1x2x128xf32>
    %40 = arith.addf %32, %39 : vector<1x2x128xf32>
    %41 = vector.broadcast %7 : f32 to vector<1x2x128xf32>
    %42 = arith.mulf %37, %41 : vector<1x2x128xf32>
    %43 = arith.addf %35, %42 : vector<1x2x128xf32>
    %c0_30 = arith.constant 0 : index
    %c0_31 = arith.constant 0 : index
    %c0_32 = arith.constant 0 : index
    %c0_33 = arith.constant 0 : index
    %44 = vector.load %arg5[%c0_30, %c0_31, %c0_32, %c0_33] : memref<1x2x2x128xf32, #tpu.memory_space<vmem>>, vector<1x1x2x128xf32>
    %45 = vector.shape_cast %44 : vector<1x1x2x128xf32> to vector<1x2x128xf32>
    %46 = vector.shape_cast %40 : vector<1x2x128xf32> to vector<1x1x2x128xf32>
    tpu.vector_store %arg5[%c0_30, %c0_31, %c0_32, %c0_33], %46 {strides = array<i32>} : memref<1x2x2x128xf32, #tpu.memory_space<vmem>>, vector<1x1x2x128xf32>,
    %c0_34 = arith.constant 0 : index
    %c1_35 = arith.constant 1 : index
    %c0_36 = arith.constant 0 : index
    %c0_37 = arith.constant 0 : index
    %47 = vector.load %arg5[%c0_34, %c1_35, %c0_36, %c0_37] : memref<1x2x2x128xf32, #tpu.memory_space<vmem>>, vector<1x1x2x128xf32>
    %48 = vector.shape_cast %47 : vector<1x1x2x128xf32> to vector<1x2x128xf32>
    %49 = vector.shape_cast %43 : vector<1x2x128xf32> to vector<1x1x2x128xf32>
    tpu.vector_store %arg5[%c0_34, %c1_35, %c0_36, %c0_37], %49 {strides = array<i32>} : memref<1x2x2x128xf32, #tpu.memory_space<vmem>>, vector<1x1x2x128xf32>,
    return
  }
  func.func @transform_0(%arg0: i32, %arg1: i32) -> (i32, i32) {
    %c0_i32 = arith.constant 0 : i32
    %c0_i32_0 = arith.constant 0 : i32
    %c0_i32_1 = arith.constant 0 : i32
    return %c0_i32, %c0_i32_0 : i32, i32
  }
  func.func @transform_1(%arg0: i32, %arg1: i32) -> i32 {
    %c0_i32 = arith.constant 0 : i32
    %c0_i32_0 = arith.constant 0 : i32
    return %c0_i32 : i32
  }
  func.func @transform_2(%arg0: i32, %arg1: i32) -> (i32, i32, i32, i32) {
    %c0_i32 = arith.constant 0 : i32
    %c0_i32_0 = arith.constant 0 : i32
    %c0_i32_1 = arith.constant 0 : i32
    return %arg0, %c0_i32, %arg1, %c0_i32_0 : i32, i32, i32, i32
  }
  func.func @transform_3(%arg0: i32, %arg1: i32) -> (i32, i32, i32, i32) {
    %c0_i32 = arith.constant 0 : i32
    %c0_i32_0 = arith.constant 0 : i32
    %c0_i32_1 = arith.constant 0 : i32
    return %arg0, %c0_i32, %arg1, %c0_i32_0 : i32, i32, i32, i32
  }
}

</mosaic_0001>

<bundles_post_ra>
// kernel: tpu_custom_call.1
= control target key start
LH: loop header
LB: loop body
LE: loop exit
PB: predicated region body
PF: predicated region fallthrough
CT: control target
= control target key end

     0   :  { %8 = vsyncpa [#allocation5], 0  ;;  %s922_s0 = inlined_call_operand.hbm [shape: f32[2,4], index: 0, kind: input, shape index: {}]   ;;  %s923_s1 = inlined_call_operand.vmem [shape: f32[2], index: 1, kind: input, shape index: {}]   ;;  %s924_s2 = inlined_call_operand.hbm [shape: f32[2,4,2,128], index: 2, kind: input, shape index: {}]   ;;  %s925_s3 = inlined_call_operand.hbm [shape: f32[2,2,2,128], index: 3, kind: output, shape index: {}]  }
   0x1   :  { %9 = vsyncpa [#allocation6], 0 }
   0x2   :  { %10 = vsyncpa [#allocation3], 0 }
   0x3   :  { %12 = vsyncpa [#allocation3 + $0x1], 0 }
   0x4   :  { %13 = vsyncpa [#allocation4], 0 }
   0x5   :  { %15 = vsyncpa [#allocation4 + $0x1], 0  ;;  %s699_s12 = smov 0   ;;  %s701_s13 = smov 0  }
   0x6   :  { %s703_s14 = smov 0   ;;  %s705_s15 = smov 0  }
   0x7   :  { %s707_s16 = smov 0   ;;  %s709_s17 = smov 0  }
   0x8 LB: > { %s401_s18 = sadd.s32 4294967295, %s669_s17   ;;  %s402_s19 = sadd.s32 4294967294, %s669_s17   ;;  %s669_s17 = sphi %s709_s17, %s21_s17   ;;  %s665_s16 = sphi %s707_s16, %s946_s16   ;;  %s661_s15 = sphi %s705_s15, %s945_s15   ;;  %s657_s14 = sphi %s703_s14, %s944_s14   ;;  %s653_s13 = sphi %s701_s13, %s943_s13   ;;  %s649_s12 = sphi %s699_s12, %s942_s12  }
   0x9   : > { %s84_s20 = sadd.s32 1, %s657_s14  ;;  %p91_p0 = scmp.ne.s32.totalorder %s657_s14, %s653_s13 }
   0xa   : > { %p92_p1 = scmp.eq.s32.totalorder %s669_s17, 0  ;;  %p97_p2 = scmp.ne.s32.totalorder %s653_s13, %s649_s12 }
   0xb   : > { %p737_p3 = scmp.eq.s32.totalorder %s401_s18, 0  ;;  %p123_p4 = scmp.eq.s32.totalorder %s401_s18, 1 }
   0xc   : > { %p93_p5 = por %p92_p1, %p91_p0  ;;  %p129_p6 = scmp.eq.s32.totalorder %s402_s19, 1 }
   0xd   : > { %s930_s21 = scalar_select %p737_p3, 1, 0 }
   0xe   : > { %p743_p7 = por %p737_p3, %p97_p2  ;;  %p747_p8 = por %p123_p4, %p91_p0 }
   0xf   : > { %p751_p9 = por %p129_p6, %p97_p2  ;;  %p403_p10 = scmp.ge.s32.totalorder %s669_s17, 1 }
  0x10   : > { %s931_s22 = scalar_select %p743_p7, 1, 0 }
  0x11   : > { %s932_s23 = scalar_select %p747_p8, 1, 0 }
  0x12   : > { %s933_s24 = scalar_select %p751_p9, 1, 0 }
  0x13   : > { %p136_p11 = scmp.lt.s32.totalorder %s669_s17, 3  ;;  %p463_p1 = scmp.lt.s32.totalorder %s669_s17, 2 }
  0x14   : > { %s158_s28 = sshll.u32 %s923_s1, 4  ;;  %s169_s4 = sand.u32 1, %s657_s14   ;;  %s159_s28 = int_to_ptr.vmem [resolvable:$true] %s158_s28 }
  0x15   : > { %p758_p13 = pnand %p403_p10, %p136_p11  ;;  %p768_p4 = pnand %p463_p1, %p93_p5 }
  0x16   : > { %s33_s5 = sadd.s32 1, %s665_s16  ;;  %s521_s8 = scalar_lea.hbm %s922_s0, 32 }
  0x17   : > { %p446_p0 = pneg %p758_p13  ;;  %p522_p5 = scmp.ne.s32.totalorder %s922_s0, %s521_s8 }
  0x18   : > { %p528_p1 = scmp.lt.u32.totalorder %s521_s8, %s922_s0 }
  0x19   : > { %p774_p2 = pnand %p446_p0, %p737_p3 }
  0x1b   : > { %p523_p6 = pneg %p774_p2 }
  0x1d   : > { %p524_p10 = pnand %p523_p6, %p522_p5 }
  0x1f   : > { %p525_p11 = pneg %p524_p10 }
  0x21   : > { %p530_p0 = pnand %p528_p1, %p525_p11 }
  0x23   : > { %533 = shalt.err (!%p530_p0)
}
  0x24   : > { %s671_s19 = smov [#allocation2]   ;;  %s534_s6 = scalar_lea.vmem %s159_s28, 16 }
  0x25   : > { %449 = dma.hbm_to_smem (!%p774_p2), %s922_s0, 32, %s671_s19, [#allocation5]  }
  0x26   : > { %p535_p12 = scmp.ne.s32.totalorder %s159_s28, %s534_s6  ;;  %p542_p7 = scmp.lt.s32.totalorder %s159_s28, %s159_s28 }
  0x27   : > { %p543_p5 = scmp.lt.s32.totalorder %s534_s6, %s534_s6 }
  0x28   : > { %p537_p9 = pnand %p535_p12, %p523_p6 }
  0x29   : > { %p544_p10 = por %p543_p5, %p542_p7 }
  0x2a   : > { %p538_p8 = pneg %p537_p9 }
  0x2c   : > { %p545_p3 = pnand %p544_p10, %p538_p8 }
  0x2e   : > { %548 = shalt.err (!%p545_p3)
}
  0x2f   : > { %s672_s7 = smov [#allocation7]   ;;  %p35_p11 = scmp.ge.s32.totalorder %s33_s5, 2 }
  0x30   : > { %452 = dma.vmem_to_smem (!%p774_p2), %s159_s28, 16, %s672_s7, [#allocation6]  }
  0x31   : > { %s407_s8 = sshll.u32 %s169_s4, 3  ;;  %s432_s9 = sshll.u32 %s665_s16, 7 }
  0x32   : > { %s948_s5 = smov (%p35_p11, %s33_s5), 0  ;;  %s806_s30 = scalar_lea.hbm %s924_s2, %s432_s9 }
  0x33   : > { %s79_s18 = ssub.s32 %s665_s16, %s948_s5  ;;  %s173_s19 = scalar_lea.vmem [#allocation8], %s407_s8 }
  0x34   : > { %s181_s28 = sshll.u32 %s173_s19, 4  ;;  %p82_p3 = scmp.eq.s32.totalorder %s79_s18, 0  ;;  %s810_s28 = int_to_ptr.vmem [resolvable:$true] %s181_s28 }
  0x35   : > { %s819_s27 = scalar_lea.sflag [#allocation3], %s169_s4  ;;  %s549_s6 = scalar_lea.hbm %s806_s30, 128 }
  0x36   : > { %s815_s26 = scalar_select %p82_p3, %s657_s14, %s84_s20  }
  0x37   : > { %p550_p7 = scmp.ne.s32.totalorder %s806_s30, %s549_s6  ;;  %p551_p8 = pneg %p768_p4 }
  0x38   : > { %s554_s9 = scalar_lea.hbm %s924_s2, 256  ;;  %p555_p2 = scmp.lt.u32.totalorder %s806_s30, %s924_s2 }
  0x39   : > { %p552_p9 = pnand %p551_p8, %p550_p7  ;;  %p556_p6 = scmp.lt.u32.totalorder %s554_s9, %s549_s6 }
  0x3a   : > { %p558_p0 = scmp.lt.u32.totalorder %s549_s6, %s806_s30 }
  0x3b   : > { %p553_p12 = pneg %p552_p9  ;;  %p557_p1 = por %p556_p6, %p555_p2 }
  0x3d   : > { %p559_p5 = por %p558_p0, %p557_p1 }
  0x3f   : > { %p560_p10 = pnand %p559_p5, %p553_p12 }
  0x41   : > { %563 = shalt.err (!%p560_p10)
}
  0x42   : > { %s564_s20 = scalar_lea.vmem %s810_s28, 128  ;;  %s673_s4 = smov [#allocation8]  }
  0x43   : > { %p565_p11 = scmp.ne.s32.totalorder %s810_s28, %s564_s20  ;;  %s569_s18 = sshll.u32 %s673_s4, 4  ;;  %s570_s18 = int_to_ptr.vmem [resolvable:$false] %s569_s18 }
  0x44   : > { %s571_s19 = scalar_lea.vmem %s570_s18, 256  ;;  %p572_p9 = scmp.lt.s32.totalorder %s810_s28, %s570_s18 }
  0x45   : > { %p567_p3 = pnand %p565_p11, %p551_p8  ;;  %p573_p2 = scmp.lt.s32.totalorder %s571_s19, %s564_s20 }
  0x47   : > { %p568_p7 = pneg %p567_p3  ;;  %p574_p6 = por %p573_p2, %p572_p9 }
  0x49   : > { %p575_p1 = pnand %p574_p6, %p568_p7 }
  0x4b   : > { %578 = shalt.err (!%p575_p1)
}
  0x4c   : > { %s674_s6 = smov 32   ;;  %s675_s7 = smov 2  }
  0x4d   : > { %456 = dma.hbm_to_vmem [thread:$0]  (!%p768_p4), %s806_s30, 128, %s810_s28, %s819_s27, %s674_s6, %s674_s6, %s675_s7  }
  0x4e   : > { %193 = sbr.rel (%p758_p13) target bundleno = 129 (0x81), region = 32  ;;  %p937_p8 = scmp.ne.s32.totalorder (!%p758_p13), %s930_s21, 0 }
  0x55   : > { %632 = dma.done.wait (%p937_p8), [#allocation5], 32  }
  0x56   : > { %634 = vsyncadd (%p937_p8), [#allocation5], 4294967264 }
  0x57   : > { %636 = dma.done.wait (%p937_p8), [#allocation6], 16  }
  0x58   : > { %638 = vsyncadd (%p937_p8), [#allocation6], 4294967280  ;;  %s858_s8 = sand.u32 1, %s653_s13   ;;  %p938_p13 = scmp.ne.s32.totalorder %s931_s22, 0 }
  0x59   : > { %s413_s25 = sshll.u32 %s858_s8, 3  ;;  %s204_s29 = scalar_lea.sflag [#allocation3], %s858_s8 }
  0x5a   : > { %s207_s30 = scalar_lea.vmem [#allocation8], %s413_s25 }
  0x5b   : > { %640 = dma.done.wait (%p938_p13), %s204_s29, 128  }
  0x5c   : > { %642 = vsyncadd (%p938_p13), %s204_s29, 4294967168 }
  0x5d   : > { %212 = sfence }
  0x5e   : > { %s231_s28 = sld [smem:[#allocation2]]  ;;  %s415_s27 = sld [smem:[#allocation2 + $0x1]]  ;;  %v241_v0 = vld [vmem:[%s207_s30] sm:$0x3]  ;;  %v423_v1 = vld [vmem:[%s207_s30 + $0x2] sm:$0x3] }
  0x5f   : > { %s416_s21 = sld [smem:[#allocation2 + $0x2]]  ;;  %s417_s9 = sld [smem:[#allocation2 + $0x3]]  ;;  %v424_v5 = vld [vmem:[%s207_s30 + $0x4] sm:$0x3]  ;;  %v425_v9 = vld [vmem:[%s207_s30 + $0x6] sm:$0x3] }
  0x60   : > { %s239_s10 = sld [smem:[#allocation7]]  ;;  %s419_s20 = sld [smem:[#allocation2 + $0x81]] }
  0x61   : > { %s418_s11 = sld [smem:[#allocation2 + $0x80]]  ;;  %s420_s4 = sld [smem:[#allocation2 + $0x82]] }
  0x62   : > { %s421_s18 = sld [smem:[#allocation2 + $0x83]]  ;;  %s422_s19 = sld [smem:[#allocation7 + $0x1]] }
  0x63   : > { %s414_s22 = sshll.u32 %s858_s8, 2  ;;  %s433_s25 = sshll.u32 %s661_s15, 6 }
  0x64   : > { %v242_v2 = vstv %s231_s28  ;;  %v252_v4 = vstv %s415_s27  ;;  %s230_s6 = scalar_lea.vmem [#allocation9], %s414_s22  ;;  %s873_s28 = scalar_lea.hbm %s925_s3, %s433_s25 }
  0x65   : > { %v243_v3 = vmul.f32 %v242_v2, %v241_v0  ;;  %v253_v6 = vmul.f32 %v423_v1, %v252_v4  ;;  %v260_v7 = vstv %s416_s21  ;;  %v268_v10 = vstv %s417_s9  ;;  %s292_s7 = sshll.u32 %s230_s6, 4  ;;  %s278_s27 = scalar_lea.sflag [#allocation4], %s858_s8  ;;  %s868_s7 = int_to_ptr.vmem [resolvable:$true] %s292_s7 }
  0x66   : > { %v244_v8 = vstv %s239_s10  ;;  %v261_v12 = vmul.f32 %v424_v5, %v260_v7  ;;  %v255_v15 = vstv %s419_s20  ;;  %v269_v18 = vmul.f32 %v425_v9, %v268_v10  ;;  %s579_s21 = scalar_lea.vmem %s868_s7, 64  ;;  %p939_p12 = scmp.ne.s32.totalorder %s932_s23, 0 }
  0x67   : > { %v245_v11 = vadd.f32 %v244_v8, %v243_v3  ;;  %v246_v13 = vstv %s418_s11  ;;  %v263_v16 = vstv %s420_s4  ;;  %v256_v20 = vmul.f32 %v423_v1, %v255_v15  ;;  %p580_p4 = scmp.ne.s32.totalorder %s868_s7, %s579_s21  ;;  %s676_s15 = smov [#allocation9]  }
  0x68   : > { %v247_v14 = vmul.f32 %v246_v13, %v241_v0  ;;  %v248_v19 = vstv %s422_s19  ;;  %v264_v22 = vmul.f32 %v424_v5, %v263_v16  ;;  %v271_v23 = vstv %s421_s18  ;;  %s583_s9 = sshll.u32 %s676_s15, 4  ;;  %s584_s9 = int_to_ptr.vmem [resolvable:$false] %s583_s9 }
  0x69   : > { %v254_v17 = vadd.f32 %v253_v6, %v245_v11  ;;  %v272_v26 = vmul.f32 %v425_v9, %v271_v23  ;;  %p581_p0 = pnand %p580_p4, %p939_p12  ;;  %s585_s10 = scalar_lea.vmem %s584_s9, 128 }
  0x6a   : > { %v249_v21 = vadd.f32 %v248_v19, %v247_v14  ;;  %p586_p10 = scmp.lt.s32.totalorder %s868_s7, %s584_s9  ;;  %p587_p11 = scmp.lt.s32.totalorder %s585_s10, %s579_s21 }
  0x6b   : > { %v262_v24 = vadd.f32 %v261_v12, %v254_v17  ;;  %p582_p5 = pneg %p581_p0 }
  0x6c   : > { %v257_v25 = vadd.f32 %v256_v20, %v249_v21  ;;  %p588_p3 = por %p587_p11, %p586_p10 }
  0x6d   : > { %v270_v27 = vadd.f32 %v269_v18, %v262_v24 }
  0x6e   : > { %v265_v28 = vadd.f32 %v264_v22, %v257_v25  ;;  %p589_p7 = pnand %p588_p3, %p582_p5 }
  0x6f   : > { %274 = vst [vmem:[%s230_s6] sm:$0x3] %v270_v27 }
  0x70   : > { %v273_v29 = vadd.f32 %v272_v26, %v265_v28 }
  0x72   : > { %426 = vst [vmem:[%s230_s6 + $0x2] sm:$0x3] %v273_v29 }
  0x73   : > { %592 = shalt.err (!%p589_p7)
}
  0x74   : > { %s593_s11 = scalar_lea.hbm %s873_s28, 64  ;;  %s597_s18 = scalar_lea.hbm %s925_s3, 128 }
  0x75   : > { %p594_p9 = scmp.ne.s32.totalorder %s873_s28, %s593_s11  ;;  %p598_p1 = scmp.lt.u32.totalorder %s873_s28, %s925_s3 }
  0x76   : > { %p599_p8 = scmp.lt.u32.totalorder %s597_s18, %s593_s11  ;;  %p601_p4 = scmp.lt.u32.totalorder %s593_s11, %s873_s28 }
  0x77   : > { %p595_p2 = pnand %p594_p9, %p939_p12 }
  0x78   : > { %p600_p13 = por %p599_p8, %p598_p1 }
  0x79   : > { %p596_p6 = pneg %p595_p2 }
  0x7a   : > { %p602_p0 = por %p601_p4, %p600_p13 }
  0x7c   : > { %p603_p5 = pnand %p602_p0, %p596_p6 }
  0x7e   : > { %606 = shalt.err (!%p603_p5)
}
  0x7f   : > { %s677_s6 = smov 32   ;;  %s678_s25 = smov 2  }
  0x80   : > { %444 = dma.vmem_to_hbm [thread:$0]  (%p939_p12), %s868_s7, 64, %s873_s28, %s278_s27, %s677_s6, %s677_s6, %s678_s25  }
  0x81 PF: > { %s307_s29 = sand.u32 1, %s649_s12   ;;  %p940_p10 = scmp.ne.s32.totalorder %s933_s24, 0 }
  0x82   : > { %p941_p11 = scmp.ge.s32.totalorder %s669_s17, 2  ;;  %s308_s30 = scalar_lea.sflag [#allocation4], %s307_s29 }
  0x84   : > { %p458_p3 = pnand %p941_p11, %p940_p10 }
  0x86   : > { %644 = dma.done.wait (!%p458_p3), %s308_s30, 64  }
  0x87   : > { %646 = vsyncadd (!%p458_p3), %s308_s30, 4294967232  ;;  %s21_s17 = sadd.s32 1, %s669_s17   ;;  %s942_s12 = smov %s653_s13 }
  0x88   : > { %p18_p7 = scmp.ge.s32.totalorder %s21_s17, 4   ;;  %s943_s13 = smov %s657_s14 }
  0x89   : > { %s944_s14 = smov %s815_s26  ;;  %s945_s15 = smov %s665_s16 }
  0x8a   : > { %s946_s16 = smov %s948_s5  ;;  %20 = sbr.rel (!%p18_p7) target bundleno = 8 (0x8), region = 91 }
  0x91   :  { %313 = vsyncpa [#allocation3], 1 }
  0x92   :  { %315 = vsyncpa [#allocation3 + $0x1], 1 }
  0x93   :  { %316 = vsyncpa [#allocation4], 1 }
  0x94   :  { %318 = vsyncpa [#allocation4 + $0x1], 1 }
  0x95   :  { %319 = vsyncpa [#allocation5], 1 }
  0x96   :  { %321 = vsyncpa [#allocation5 + $0x1], 1 }
  0x97   :  { %322 = vsyncpa [#allocation6], 1 }
  0x98   :  { %324 = vsyncpa [#allocation6 + $0x1], 1 }

</bundles_post_ra>
